<compile_context>
chip_gen: v7x
topology: tpu7x:2x2x1
jax: 0.10.0
libtpu: 0.0.40
codegen_flags: <defaults>
</compile_context>

<pallas_src>
import jax
import jax.numpy as jnp
from jax.experimental import pallas as pl
from jax.experimental.pallas import tpu as pltpu
import numpy as np


_SUB_ROWS = 256  # one-hot sub-chunk size: bounds the vreg live range of the (rows, T) one-hot


def _gather_rows(idx_ref, proj_ref, out_ref, start, rows):
    """out[start:start+rows] = onehot(idx[start:start+rows]) @ P  (one MXU matmul)."""
    total_tokens = proj_ref.shape[0]
    idx = idx_ref[pl.ds(start, rows), :]                               # (rows, 1) int32
    iota = jax.lax.broadcasted_iota(jnp.int32, (rows, total_tokens), 1)
    onehot = (idx == iota).astype(jnp.float32)                         # (rows, T), exact 0/1
    out = jnp.dot(onehot, proj_ref[...],
                  preferred_element_type=jnp.float32)                  # (rows, H)
    out_ref[pl.ds(start, rows), :] = out.astype(out_ref.dtype)


def dpt_prompt_kernel(idx_ref, proj_ref, out_ref):
    # idx_ref  : (BLOCK, 1)         int32    virtual-token ids for this row block
    # proj_ref : (total_tokens, H)  float32  pre-projected table P = emb @ W^T
    # out_ref  : (BLOCK, H)         out_dtype
    block = out_ref.shape[0]
    sub = min(_SUB_ROWS, block)
    n_full = block // sub
    rem = block - n_full * sub

    if n_full == 1:
        _gather_rows(idx_ref, proj_ref, out_ref, 0, sub)
    elif n_full > 1:
        def body(c, carry):
            _gather_rows(idx_ref, proj_ref, out_ref,
                         pl.multiple_of(c * sub, sub), sub)
            return carry
        jax.lax.fori_loop(0, n_full, body, 0)
    if rem:
        _gather_rows(idx_ref, proj_ref, out_ref, n_full * sub, rem)


def _choose_block_rows(n_rows, max_block_rows):
    """Row-block size: prefer no padding (divides n_rows) and >=2 grid steps (v7x megacore)."""
    max_block_rows = max(8, max_block_rows - max_block_rows % 8)
    if n_rows <= 256 and n_rows <= max_block_rows:
        return n_rows                                  # single full-extent block, no pad
    hi = min(max_block_rows, n_rows // 2)
    hi -= hi % 8
    for cand in range(hi, 7, -8):                      # multiples of 8 that divide n_rows
        if n_rows % cand == 0:
            return cand
    if n_rows <= max_block_rows:
        return n_rows                                  # no clean split: one full block
    return max_block_rows                              # rare fallback: caller pads + slices


def dpt_prompt_embedding(indices, emb_table, weight_t, *,
                         max_block_rows=1024,
                         out_dtype=jnp.float32,
                         single_buffer_proj=False):
    """indices: (B, T) int; emb_table: (total_tokens, r); weight_t: (r, hidden)."""
    B, T = indices.shape
    total_tokens, r = emb_table.shape
    hidden = weight_t.shape[1]
    N = B * T
    itemsize = jnp.dtype(out_dtype).itemsize

    # Hoisted fusion (exact under a one-hot gather): P = emb @ W^T, computed once in the
    # wrapper instead of once per grid step inside the kernel.
    proj = jnp.dot(emb_table, weight_t, preferred_element_type=jnp.float32)

    idx_flat = indices.reshape(N, 1).astype(jnp.int32)

    # Cap the row block so the double-buffered output block stays within a conservative
    # budget that fits v7x's 64 MiB VMEM alongside P and the index block.
    out_budget = 16 << 20
    row_cap = max(8, (out_budget // (2 * hidden * itemsize)) // 8 * 8)
    block_rows = _choose_block_rows(N, min(max_block_rows, row_cap))

    n_pad = pl.cdiv(N, block_rows) * block_rows        # == N in the common (no-pad) case
    if n_pad != N:
        # Rare fallback (no clean divisor and N > max block): pad the tail block; padded
        # rows are sliced off afterwards.
        idx_flat = jnp.pad(idx_flat, ((0, n_pad - N), (0, 0)))
    grid = (n_pad // block_rows,)

    # Explicit VMEM budget (v5e's default scoped limit is only 16 MiB).
    vmem_bytes = (2 * block_rows * hidden * itemsize   # output block, double-buffered
                  + 2 * block_rows * 4                 # index block, double-buffered
                  + 2 * total_tokens * hidden * 4      # P (budgeted double-buffered)
                  + (2 << 20))                         # scratch slack
    vmem_limit = int(min(max(vmem_bytes, 32 << 20), 64 << 20))

    proj_spec_kwargs = {}
    if single_buffer_proj:
        # P's block index never changes, so one VMEM buffer suffices; opt-in because the
        # budget above already assumes two buffers and support varies by JAX version.
        proj_spec_kwargs["pipeline_mode"] = pl.Buffered(1)

    out_flat = pl.pallas_call(
        dpt_prompt_kernel,
        out_shape=jax.ShapeDtypeStruct((n_pad, hidden), out_dtype),
        grid_spec=pltpu.PrefetchScalarGridSpec(
            num_scalar_prefetch=0,
            grid=grid,
            in_specs=[
                pl.BlockSpec((block_rows, 1), lambda i: (i, 0)),
                pl.BlockSpec((total_tokens, hidden), lambda i: (0, 0),
                             **proj_spec_kwargs),
            ],
            out_specs=pl.BlockSpec((block_rows, hidden), lambda i: (i, 0)),
        ),
        compiler_params=pltpu.CompilerParams(
            dimension_semantics=("parallel",),   # row blocks shard across v7x's two TCs
            vmem_limit_bytes=vmem_limit,
        ),
    )(idx_flat, proj)

    if n_pad != N:
        out_flat = out_flat[:N]
    return out_flat.reshape(B, T, hidden)


if __name__ == "__main__":
    # Config: num_virtual_tokens=4, num_transformer_submodules=2 -> 8 total tokens,
    # r=8, word-embedding hidden dim=32, batch=2.
    num_virtual_tokens = 4
    num_transformer_submodules = 2
    total_virtual_tokens = num_virtual_tokens * num_transformer_submodules  # 8
    r = 8
    hidden = 32
    batch = 2

    key = jax.random.PRNGKey(0)
    k_emb, k_w, k_idx = jax.random.split(key, 3)

    # Deterministic synthetic parameters (shapes match the PyTorch module).
    emb_table = jax.random.normal(k_emb, (total_virtual_tokens, r),
                                  dtype=jnp.float32)                  # nn.Embedding.weight
    # nn.Linear(r, hidden).weight is (hidden, r); the kernel takes its transpose.
    w = jax.random.normal(k_w, (hidden, r), dtype=jnp.float32) * (1.0 / np.sqrt(r))
    weight_t = w.T                                                    # (r, hidden)

    # Prompt indices: (batch, total_virtual_tokens) in [0, total_virtual_tokens)
    indices = jax.random.randint(k_idx, (batch, total_virtual_tokens),
                                 0, total_virtual_tokens, dtype=jnp.int32)

    out = dpt_prompt_embedding(indices, emb_table, weight_t)
    out = jax.block_until_ready(out)

    # Pure-JAX reference (module semantics: gather then project).
    ref = jnp.take(emb_table, indices, axis=0) @ weight_t
    np.testing.assert_allclose(np.asarray(out), np.asarray(ref),
                               rtol=1e-5, atol=1e-5)

    print("KERNEL_OK")
</pallas_src>

<mosaic_0001>
module attributes {stable_mosaic.version = 11 : i64} {
  func.func @dpt_prompt_kernel(%arg0: i32, %arg1: memref<16x1xi32, #tpu.memory_space<vmem>>, %arg2: memref<8x32xf32, #tpu.memory_space<vmem>>, %arg3: memref<16x32xf32, #tpu.memory_space<vmem>>) attributes {dimension_semantics = [#tpu.dimension_semantics<parallel>], iteration_bounds = array<i64: 1>, scalar_prefetch = 0 : i64, scratch_operands = 0 : i64, tpu.core_type = #tpu.core_type<tc>, window_params = [{transform_indices = @transform_0, window_bounds = array<i64: 16, 1>}, {pipeline_mode = #tpu.pipeline_mode<synchronous>, transform_indices = @transform_1, window_bounds = array<i64: 8, 32>}, {transform_indices = @transform_2, window_bounds = array<i64: 16, 32>}]} {
    %c0 = arith.constant 0 : index
    %c0_0 = arith.constant 0 : index
    %0 = vector.load %arg1[%c0, %c0_0] : memref<16x1xi32, #tpu.memory_space<vmem>>, vector<16x1xi32>
    %1 = tpu.iota {dimensions = array<i32: 1>} : vector<16x8xi32>
    %2 = vector.broadcast %0 : vector<16x1xi32> to vector<16x8xi32>
    %3 = arith.cmpi eq, %2, %1 : vector<16x8xi32>
    %4 = arith.extui %3 : vector<16x8xi1> to vector<16x8xi32>
    %5 = arith.sitofp %4 : vector<16x8xi32> to vector<16x8xf32>
    %c0_1 = arith.constant 0 : index
    %c0_2 = arith.constant 0 : index
    %6 = vector.load %arg2[%c0_1, %c0_2] : memref<8x32xf32, #tpu.memory_space<vmem>>, vector<8x32xf32>
    %cst = arith.constant dense<0.000000e+00> : vector<16x32xf32>
    %7 = tpu.matmul %5, %6, %cst {dimension_numbers = #tpu.dot_dimension_numbers<[1], [0], [0], [1], [0, 0, 1, 1], [], []>} : vector<16x8xf32>, vector<8x32xf32>, vector<16x32xf32> -> vector<16x32xf32>
    %c0_3 = arith.constant 0 : index
    %c0_4 = arith.constant 0 : index
    %8 = vector.load %arg3[%c0_3, %c0_4] : memref<16x32xf32, #tpu.memory_space<vmem>>, vector<16x32xf32>
    tpu.vector_store %arg3[%c0_3, %c0_4], %7 {strides = array<i32>} : memref<16x32xf32, #tpu.memory_space<vmem>>, vector<16x32xf32>,
    return
  }
  func.func @transform_0(%arg0: i32) -> (i32, i32) {
    %c0_i32 = arith.constant 0 : i32
    %c0_i32_0 = arith.constant 0 : i32
    return %arg0, %c0_i32 : i32, i32
  }
  func.func @transform_1(%arg0: i32) -> (i32, i32) {
    %c0_i32 = arith.constant 0 : i32
    %c0_i32_0 = arith.constant 0 : i32
    %c0_i32_1 = arith.constant 0 : i32
    return %c0_i32, %c0_i32_0 : i32, i32
  }
  func.func @transform_2(%arg0: i32) -> (i32, i32) {
    %c0_i32 = arith.constant 0 : i32
    %c0_i32_0 = arith.constant 0 : i32
    return %arg0, %c0_i32 : i32, i32
  }
}

</mosaic_0001>

<bundles_post_ra>
// kernel: tpu_custom_call.1
= control target key start
LH: loop header
LB: loop body
LE: loop exit
PB: predicated region body
PF: predicated region fallthrough
CT: control target
= control target key end

     0   :  { %s213_s0 = inlined_call_operand.vmem [shape: s32[16,1], index: 0, kind: input, shape index: {}]   ;;  %s214_s1 = inlined_call_operand.vmem [shape: f32[8,32], index: 1, kind: input, shape index: {}]   ;;  %s215_s2 = inlined_call_operand.hbm [shape: f32[16,32], index: 2, kind: output, shape index: {}]  }
   0x1   :  { %v12_v0 = vld [vmem:[%s213_s0] sm:$0xff] }
   0x2   :  { %7 = vsyncpa [#allocation3], 0  ;;  %v172_v1 = vmov 0   ;;  %v13_v2 = vld [vmem:[%s213_s0 + $0x8] sm:$0xff]  ;;  %v28_v3 = vld [vmem:[%s214_s1] sm:$0xff]  ;;  %v14_v4 = vlaneseq  ;;  %vm29_vm0 = vcmask 64512  }
   0x3   :  { %147 = vset.pattern.permute.xlu0 %v172_v1  ;;  %137 = vmatprep.subr.mxu0 %v28_v3  ;;  %v173_v7 = vmov 0.0   ;;  %s174_s0 = smov [#allocation2]   ;;  %vm111_vm3 = vcmask 261120  }
   0x4   :  { %17 = vperm.xlu0 %147, %v12_v0   ;;  %138 = vmatpush3.msra.mxu0 %v28_v3  ;;  %v15_v5 = vand.u32 127, %v14_v4  ;;  %s119_s15 = sshll.u32 %s174_s0, 4  ;;  %s120_s15 = int_to_ptr.vmem [resolvable:$true] %s119_s15 }
   0x5   :  { %s148_s1 = scalar_lea.vmem %s120_s15, 256  ;;  %p153_p1 = scmp.lt.s32.totalorder %s120_s15, %s120_s15 }
   0x6   :  { %p149_p0 = scmp.ne.s32.totalorder %s120_s15, %s148_s1  ;;  %p154_p2 = scmp.lt.s32.totalorder %s148_s1, %s148_s1 }
   0x8   :  { %20 = vperm.xlu0 %147, %v13_v2   ;;  %p155_p3 = por %p154_p2, %p153_p1 }
   0xa   :  { %p156_p4 = pnand %p155_p3, %p149_p0 }
  0x83   :  { %v18_v6 = vpop.permute.xlu0 %17 }
  0x84   :  { %vm22_vm1 = vcmp.eq.s32.totalorder %v18_v6, %v15_v5 }
  0x85   :  { %v130_v8 = vsel %vm22_vm1, 1.0, %v173_v7 }
  0x86   :  { %139 = vmatprep.mubr.msk.f32.mxu0 %vm29_vm0, %v130_v8 }
  0x87   :  { %v21_v9 = vpop.permute.xlu0 %20 }
  0x88   :  { %vm23_vm2 = vcmp.eq.s32.totalorder %v21_v9, %v15_v5 }
  0x89   :  { %v131_v10 = vsel %vm23_vm2, 1.0, %v173_v7 }
  0x8a   :  { %140 = vmatmul.mubr.msk.f32.vlgmr.msra.gmra.mrb[0].mxu0 %vm29_vm0, %v131_v10 }
 0x15d   :  { %v141_v11 = vpop.f32.mrb[0].mxu0 }
 0x15e   :  { %113 = vst.msk [vmem:[#allocation2 + $0x8] sm:$0xff] %vm111_vm3, %v141_v11  ;;  %v102_v12 = vpop.f32.mrb[1].mxu0 }
 0x15f   :  { %112 = vst.msk [vmem:[#allocation2] sm:$0xff] %vm111_vm3, %v102_v12 }
 0x160   :  { %159 = shalt.err (!%p156_p4)
}
 0x161   :  { %s160_s18 = scalar_lea.hbm %s215_s2, 256 }
 0x162   :  { %p161_p5 = scmp.ne.s32.totalorder %s215_s2, %s160_s18  ;;  %p164_p6 = scmp.lt.u32.totalorder %s160_s18, %s215_s2 }
 0x164   :  { %p166_p7 = pnand %p164_p6, %p161_p5 }
 0x166   :  { %169 = shalt.err (!%p166_p7)
}
 0x167   :  { %s175_s23 = smov 128   ;;  %s176_s24 = smov 8  }
 0x168   :  { %125 = dma.vmem_to_hbm [thread:$0]  %s120_s15, 256, %s215_s2, [#allocation3], %s175_s23, %s175_s23, %s176_s24  }
 0x169   :  { %170 = dma.done.wait [#allocation3], 256  }
 0x16a   :  { %171 = vsyncadd [#allocation3], 4294967040 }
 0x16b   :  { %129 = vsyncpa [#allocation3], 1 }

</bundles_post_ra>
